<compile_context>
chip_gen: v7x
topology: tpu7x:2x2x1
jax: 0.10.0
libtpu: 0.0.40
codegen_flags: <defaults>
</compile_context>

<pallas_src>
import functools

import jax
import jax.numpy as jnp
from jax import lax
from jax.experimental import pallas as pl
from jax.experimental.pallas import tpu as pltpu


def _embed_kernel(x_ref, w_ref, pos_ref, cls_ref, o_ref, *, merge_rows):
    # x_ref   : (Bt, NP,   Kp)  bf16  flattened patches (K zero-padded to Kp)
    # w_ref   : (Kp, Dp)        bf16  projection weight (zero-padded rows/cols)
    # pos_ref : (NP, Dp)        f32   pos-emb rows 1.. with conv bias folded in
    # cls_ref : (1,  Dp)        f32   cls token + pos-emb row 0
    # o_ref   : (Bt, NP+1, Dp)  bf16  tokens (row 0 = cls, rows 1.. = patches)
    bt, n_p, kp = x_ref.shape
    dp = w_ref.shape[1]
    if merge_rows:
        # NP is 16-aligned: merge/split reshapes are layout-free views.
        x2 = x_ref[...].reshape(bt * n_p, kp)
        proj = jnp.dot(x2, w_ref[...], preferred_element_type=jnp.float32)
        proj = proj.reshape(bt, n_p, dp)
    else:
        # NP not sublane-aligned: contract directly on the 3-D tile so the MXU
        # operands keep their native layout (no per-step relayout copy).
        proj = lax.dot_general(x_ref[...], w_ref[...],
                               dimension_numbers=(((2,), (0,)), ((), ())),
                               preferred_element_type=jnp.float32)
    # f32 VPU tail; cast to the (bf16) output dtype only on the final store.
    o_ref[:, 1:, :] = (proj + pos_ref[...]).astype(o_ref.dtype)
    cls = cls_ref[...].reshape(1, 1, dp)
    o_ref[:, :1, :] = jnp.broadcast_to(cls, (bt, 1, dp)).astype(o_ref.dtype)


def _round_up(x, m):
    return (x + m - 1) // m * m


def _tpu_vmem_and_cores():
    """Physical VMEM bytes per TensorCore and TC count per chip (best effort)."""
    vmem = 64 * 1024 * 1024                       # conservative fallback (v7x)
    try:
        info = pltpu.get_tpu_info()
        vmem = int(getattr(info, "vmem_capacity_bytes", vmem)) or vmem
    except Exception:
        pass
    # v7x: 64 MiB VMEM / TC, 2 TCs per chip.  v5e/v6e: 128 MiB, 1 TC.
    n_cores = 2 if vmem <= 64 * 1024 * 1024 else 1
    return vmem, n_cores


def _choose_bt(B, NP, Kp, Dp, out_bytes, vmem_budget, n_cores):
    """Largest batch block fitting the budget; split only for multi-TC chips."""
    def need(bt):
        x_blk = bt * NP * Kp * 2                       # bf16 patches
        o_blk = bt * (NP + 1) * Dp * out_bytes         # output tokens
        proj = bt * NP * Dp * 4                        # in-kernel f32 matmul result
        consts = Kp * Dp * 2 + NP * Dp * 4 + Dp * 4    # w + pos + cls (single-buffered)
        return 2 * x_blk + 2 * o_blk + proj + consts   # x / o are double-buffered

    cands = [bt for bt in range(1, B + 1) if B % bt == 0 and need(bt) <= vmem_budget]
    if not cands:
        return 1
    best = max(cands)
    if n_cores > 1 and best == B and B > 1:
        # Shard grid steps across TensorCores only if steps divide evenly and
        # each step still keeps the MXU M-dimension well fed (>= 512 rows).
        for bt in sorted(cands, reverse=True):
            steps = B // bt
            if steps > 1 and steps % n_cores == 0 and bt * NP >= 512:
                return bt
    return best


def embedding_layer(x_nhwc, conv_w, conv_b, cls_token, pos_emb, patch_size,
                    out_dtype=jnp.bfloat16, single_buffer_consts=True):
    """x_nhwc: (B, H, W, C) float32 — matches the PyTorch forward's input.

    Returns (B, num_patches + 1, embed_dim) tokens.  `out_dtype` defaults to
    bf16 (halves output HBM traffic); pass jnp.float32 for exact dtype parity
    with the PyTorch module.
    """
    B, H, W, C = x_nhwc.shape
    P = patch_size
    D = conv_w.shape[0]
    nph, npw = H // P, W // P
    NP = nph * npw
    K = P * P * C
    Kp = _round_up(K, 128)                    # full, lane-aligned MXU passes
    Dp = _round_up(D, 128)                    # lane-dense (unmasked) stores
    out_bytes = jnp.dtype(out_dtype).itemsize

    # Patch extraction in (kh, kw, C) order: only the (P, npw) middle axes are
    # swapped and C stays contiguous on the lane axis; allow_input_fusion lets
    # XLA fold this + the bf16 cast into the kernel's input DMA.
    # TODO(synk): if HLO shows the producer does not fuse, grid directly over
    # x_nhwc with a per-patch-row-band block and do the swap + cast in VMEM.
    patches = x_nhwc.reshape(B, nph, P, npw, P, C)
    patches = patches.transpose(0, 1, 3, 2, 4, 5).reshape(B, NP, K)
    patches = patches.astype(jnp.bfloat16)
    if Kp != K:
        patches = jnp.pad(patches, ((0, 0), (0, 0), (0, Kp - K)))

    # Conv weight (D, C, P, P) -> (kh, kw, C, D) -> (K, D); zero-pad to (Kp, Dp).
    w = conv_w.transpose(2, 3, 1, 0).reshape(K, D).astype(jnp.bfloat16)
    w = jnp.pad(w, ((0, Kp - K), (0, Dp - D)))
    # Fold the conv bias into the positional embedding (frees one input + add).
    pos = pos_emb.reshape(NP + 1, D).astype(jnp.float32)
    pos_bias = pos[1:, :] + conv_b.reshape(1, D).astype(jnp.float32)
    cls_row = cls_token.reshape(1, D).astype(jnp.float32) + pos[:1, :]
    if Dp != D:
        pos_bias = jnp.pad(pos_bias, ((0, 0), (0, Dp - D)))
        cls_row = jnp.pad(cls_row, ((0, 0), (0, Dp - D)))

    vmem, n_cores = _tpu_vmem_and_cores()
    vmem_budget = (vmem * 3) // 5             # ~60% of physical for blocks
    vmem_limit = (vmem * 3) // 4              # ~75% scoped limit (headroom)
    Bt = _choose_bt(B, NP, Kp, Dp, out_bytes, vmem_budget, n_cores)
    grid = (B // Bt,)
    merge_rows = (NP % 16 == 0)               # bf16 sublane pack -> free reshape

    const_kw = dict(pipeline_mode=pl.Buffered(1)) if single_buffer_consts else {}
    tokens = pl.pallas_call(
        functools.partial(_embed_kernel, merge_rows=merge_rows),
        out_shape=jax.ShapeDtypeStruct((B, NP + 1, Dp), out_dtype),
        grid=grid,
        in_specs=[
            pl.BlockSpec((Bt, NP, Kp), lambda i: (i, 0, 0)),
            pl.BlockSpec((Kp, Dp), lambda i: (0, 0), **const_kw),
            pl.BlockSpec((NP, Dp), lambda i: (0, 0), **const_kw),
            pl.BlockSpec((1, Dp), lambda i: (0, 0), **const_kw),
        ],
        out_specs=pl.BlockSpec((Bt, NP + 1, Dp), lambda i: (i, 0, 0)),
        compiler_params=pltpu.CompilerParams(
            dimension_semantics=("parallel",),
            vmem_limit_bytes=int(vmem_limit),
            allow_input_fusion=[True, False, False, False],
        ),
    )(patches, w, pos_bias, cls_row)

    return tokens[:, :, :D]                   # identity slice when D % 128 == 0


def _reference(x_nhwc, conv_w, conv_b, cls_token, pos_emb, patch_size):
    """Plain-JAX f32 reference mirroring the PyTorch forward."""
    B, H, W, C = x_nhwc.shape
    P = patch_size
    D = conv_w.shape[0]
    nph, npw = H // P, W // P
    NP = nph * npw
    patches = x_nhwc.reshape(B, nph, P, npw, P, C)
    patches = patches.transpose(0, 1, 3, 5, 2, 4).reshape(B, NP, C * P * P)
    proj = jnp.einsum("bnk,dk->bnd", patches, conv_w.reshape(D, -1)) + conv_b
    cls = jnp.broadcast_to(cls_token.reshape(1, 1, D), (B, 1, D))
    tok = jnp.concatenate([cls, proj], axis=1)
    return tok + pos_emb.reshape(1, NP + 1, D)


if __name__ == "__main__":
    # Small ViT-ish config: img_size=16, patch_size=4, in_channels=4, embed_dim=32
    img_size, patch_size, in_channels, embed_dim, batch = 16, 4, 4, 32, 2
    num_patches = (img_size // patch_size) ** 2

    key = jax.random.PRNGKey(0)
    kx, kw, kb, kc, kp = jax.random.split(key, 5)
    x = jax.random.normal(kx, (batch, img_size, img_size, in_channels), jnp.float32)
    conv_w = jax.random.normal(
        kw, (embed_dim, in_channels, patch_size, patch_size), jnp.float32) * 0.05
    conv_b = jax.random.normal(kb, (embed_dim,), jnp.float32) * 0.05
    cls_token = jax.random.normal(kc, (1, 1, embed_dim), jnp.float32)
    pos_emb = jax.random.normal(kp, (1, num_patches + 1, embed_dim), jnp.float32)

    embed = jax.jit(embedding_layer,
                    static_argnames=("patch_size", "single_buffer_consts"))
    try:
        out = jax.block_until_ready(
            embed(x, conv_w, conv_b, cls_token, pos_emb,
                  patch_size=patch_size, single_buffer_consts=True))
    except Exception:
        # pipeline_mode=pl.Buffered(1) unsupported on this jax build: fall back
        # to default (double-buffered) constant operands.
        out = jax.block_until_ready(
            embed(x, conv_w, conv_b, cls_token, pos_emb,
                  patch_size=patch_size, single_buffer_consts=False))

    ref = _reference(x, conv_w, conv_b, cls_token, pos_emb, patch_size)
    assert out.shape == (batch, num_patches + 1, embed_dim)
    # bf16 MXU operands + bf16 output store, f32 accumulation -> loose tolerance.
    assert jnp.allclose(out.astype(jnp.float32), ref, atol=5e-2, rtol=5e-2), \
        float(jnp.max(jnp.abs(out.astype(jnp.float32) - ref)))
    print("KERNEL_OK")
</pallas_src>

<mosaic_0001>
module attributes {stable_mosaic.version = 11 : i64} {
  func.func @_embed_kernel(%arg0: i32, %arg1: memref<2x16x128xbf16, #tpu.memory_space<vmem>>, %arg2: memref<128x128xbf16, #tpu.memory_space<vmem>>, %arg3: memref<16x128xf32, #tpu.memory_space<vmem>>, %arg4: memref<1x128xf32, #tpu.memory_space<vmem>>, %arg5: memref<2x17x128xbf16, #tpu.memory_space<vmem>>) attributes {dimension_semantics = [#tpu.dimension_semantics<parallel>], iteration_bounds = array<i64: 1>, scalar_prefetch = 0 : i64, scratch_operands = 0 : i64, tpu.core_type = #tpu.core_type<tc>, window_params = [{transform_indices = @transform_0, window_bounds = array<i64: 2, 16, 128>}, {pipeline_mode = #tpu.pipeline_mode<synchronous>, transform_indices = @transform_1, window_bounds = array<i64: 128, 128>}, {pipeline_mode = #tpu.pipeline_mode<synchronous>, transform_indices = @transform_2, window_bounds = array<i64: 16, 128>}, {pipeline_mode = #tpu.pipeline_mode<synchronous>, transform_indices = @transform_3, window_bounds = array<i64: 1, 128>}, {transform_indices = @transform_4, window_bounds = array<i64: 2, 17, 128>}]} {
    %c0 = arith.constant 0 : index
    %c0_0 = arith.constant 0 : index
    %c0_1 = arith.constant 0 : index
    %0 = vector.load %arg1[%c0, %c0_0, %c0_1] : memref<2x16x128xbf16, #tpu.memory_space<vmem>>, vector<2x16x128xbf16>
    %1 = vector.shape_cast %0 : vector<2x16x128xbf16> to vector<32x128xbf16>
    %c0_2 = arith.constant 0 : index
    %c0_3 = arith.constant 0 : index
    %2 = vector.load %arg2[%c0_2, %c0_3] : memref<128x128xbf16, #tpu.memory_space<vmem>>, vector<128x128xbf16>
    %cst = arith.constant dense<0.000000e+00> : vector<32x128xf32>
    %3 = tpu.matmul %1, %2, %cst {dimension_numbers = #tpu.dot_dimension_numbers<[1], [0], [0], [1], [0, 0, 1, 1], [], []>} : vector<32x128xbf16>, vector<128x128xbf16>, vector<32x128xf32> -> vector<32x128xf32>
    %4 = vector.shape_cast %3 : vector<32x128xf32> to vector<2x16x128xf32>
    %c0_4 = arith.constant 0 : index
    %c0_5 = arith.constant 0 : index
    %5 = vector.load %arg3[%c0_4, %c0_5] : memref<16x128xf32, #tpu.memory_space<vmem>>, vector<16x128xf32>
    %6 = vector.shape_cast %5 : vector<16x128xf32> to vector<1x16x128xf32>
    %7 = vector.broadcast %6 : vector<1x16x128xf32> to vector<2x16x128xf32>
    %8 = arith.addf %4, %7 : vector<2x16x128xf32>
    %9 = arith.truncf %8 : vector<2x16x128xf32> to vector<2x16x128xbf16>
    %c0_6 = arith.constant 0 : index
    %c1 = arith.constant 1 : index
    %c0_7 = arith.constant 0 : index
    %10 = vector.load %arg5[%c0_6, %c1, %c0_7] : memref<2x17x128xbf16, #tpu.memory_space<vmem>>, vector<2x16x128xbf16>
    tpu.vector_store %arg5[%c0_6, %c1, %c0_7], %9 {strides = array<i32>} : memref<2x17x128xbf16, #tpu.memory_space<vmem>>, vector<2x16x128xbf16>,
    %c0_8 = arith.constant 0 : index
    %c0_9 = arith.constant 0 : index
    %11 = vector.load %arg4[%c0_8, %c0_9] : memref<1x128xf32, #tpu.memory_space<vmem>>, vector<1x128xf32>
    %12 = vector.shape_cast %11 : vector<1x128xf32> to vector<1x1x128xf32>
    %13 = vector.shape_cast %12 : vector<1x1x128xf32> to vector<1x1x128xf32>
    %14 = vector.broadcast %13 : vector<1x1x128xf32> to vector<2x1x128xf32>
    %15 = arith.truncf %14 : vector<2x1x128xf32> to vector<2x1x128xbf16>
    %c0_10 = arith.constant 0 : index
    %c0_11 = arith.constant 0 : index
    %c0_12 = arith.constant 0 : index
    %16 = vector.load %arg5[%c0_10, %c0_11, %c0_12] : memref<2x17x128xbf16, #tpu.memory_space<vmem>>, vector<2x1x128xbf16>
    tpu.vector_store %arg5[%c0_10, %c0_11, %c0_12], %15 {strides = array<i32>} : memref<2x17x128xbf16, #tpu.memory_space<vmem>>, vector<2x1x128xbf16>,
    return
  }
  func.func @transform_0(%arg0: i32) -> (i32, i32, i32) {
    %c0_i32 = arith.constant 0 : i32
    %c0_i32_0 = arith.constant 0 : i32
    %c0_i32_1 = arith.constant 0 : i32
    return %arg0, %c0_i32, %c0_i32_0 : i32, i32, i32
  }
  func.func @transform_1(%arg0: i32) -> (i32, i32) {
    %c0_i32 = arith.constant 0 : i32
    %c0_i32_0 = arith.constant 0 : i32
    %c0_i32_1 = arith.constant 0 : i32
    return %c0_i32, %c0_i32_0 : i32, i32
  }
  func.func @transform_2(%arg0: i32) -> (i32, i32) {
    %c0_i32 = arith.constant 0 : i32
    %c0_i32_0 = arith.constant 0 : i32
    %c0_i32_1 = arith.constant 0 : i32
    return %c0_i32, %c0_i32_0 : i32, i32
  }
  func.func @transform_3(%arg0: i32) -> (i32, i32) {
    %c0_i32 = arith.constant 0 : i32
    %c0_i32_0 = arith.constant 0 : i32
    %c0_i32_1 = arith.constant 0 : i32
    return %c0_i32, %c0_i32_0 : i32, i32
  }
  func.func @transform_4(%arg0: i32) -> (i32, i32, i32) {
    %c0_i32 = arith.constant 0 : i32
    %c0_i32_0 = arith.constant 0 : i32
    %c0_i32_1 = arith.constant 0 : i32
    return %arg0, %c0_i32, %c0_i32_0 : i32, i32, i32
  }
}

module attributes {stable_mosaic.version = 11 : i64} {
  func.func @_embed_kernel(%arg0: i32, %arg1: memref<2x16x128xbf16, #tpu.memory_space<vmem>>, %arg2: memref<128x128xbf16, #tpu.memory_space<vmem>>, %arg3: memref<16x128xf32, #tpu.memory_space<vmem>>, %arg4: memref<1x128xf32, #tpu.memory_space<vmem>>, %arg5: memref<2x17x128xbf16, #tpu.memory_space<vmem>>) attributes {dimension_semantics = [#tpu.dimension_semantics<parallel>], iteration_bounds = array<i64: 1>, scalar_prefetch = 0 : i64, scratch_operands = 0 : i64, tpu.core_type = #tpu.core_type<tc>, window_params = [{transform_indices = @transform_0, window_bounds = array<i64: 2, 16, 128>}, {pipeline_mode = #tpu.pipeline_mode<synchronous>, transform_indices = @transform_1, window_bounds = array<i64: 128, 128>}, {pipeline_mode = #tpu.pipeline_mode<synchronous>, transform_indices = @transform_2, window_bounds = array<i64: 16, 128>}, {pipeline_mode = #tpu.pipeline_mode<synchronous>, transform_indices = @transform_3, window_bounds = array<i64: 1, 128>}, {transform_indices = @transform_4, window_bounds = array<i64: 2, 17, 128>}]} {
    %c0 = arith.constant 0 : index
    %c0_0 = arith.constant 0 : index
    %c0_1 = arith.constant 0 : index
    %0 = vector.load %arg1[%c0, %c0_0, %c0_1] : memref<2x16x128xbf16, #tpu.memory_space<vmem>>, vector<2x16x128xbf16>
    %1 = vector.shape_cast %0 : vector<2x16x128xbf16> to vector<32x128xbf16>
    %c0_2 = arith.constant 0 : index
    %c0_3 = arith.constant 0 : index
    %2 = vector.load %arg2[%c0_2, %c0_3] : memref<128x128xbf16, #tpu.memory_space<vmem>>, vector<128x128xbf16>
    %cst = arith.constant dense<0.000000e+00> : vector<32x128xf32>
    %3 = tpu.matmul %1, %2, %cst {dimension_numbers = #tpu.dot_dimension_numbers<[1], [0], [0], [1], [0, 0, 1, 1], [], []>} : vector<32x128xbf16>, vector<128x128xbf16>, vector<32x128xf32> -> vector<32x128xf32>
    %4 = vector.shape_cast %3 : vector<32x128xf32> to vector<2x16x128xf32>
    %c0_4 = arith.constant 0 : index
    %c0_5 = arith.constant 0 : index
    %5 = vector.load %arg3[%c0_4, %c0_5] : memref<16x128xf32, #tpu.memory_space<vmem>>, vector<16x128xf32>
    %6 = vector.shape_cast %5 : vector<16x128xf32> to vector<1x16x128xf32>
    %7 = vector.broadcast %6 : vector<1x16x128xf32> to vector<2x16x128xf32>
    %8 = arith.addf %4, %7 : vector<2x16x128xf32>
    %9 = arith.truncf %8 : vector<2x16x128xf32> to vector<2x16x128xbf16>
    %c0_6 = arith.constant 0 : index
    %c1 = arith.constant 1 : index
    %c0_7 = arith.constant 0 : index
    %10 = vector.load %arg5[%c0_6, %c1, %c0_7] : memref<2x17x128xbf16, #tpu.memory_space<vmem>>, vector<2x16x128xbf16>
    tpu.vector_store %arg5[%c0_6, %c1, %c0_7], %9 {strides = array<i32>} : memref<2x17x128xbf16, #tpu.memory_space<vmem>>, vector<2x16x128xbf16>,
    %c0_8 = arith.constant 0 : index
    %c0_9 = arith.constant 0 : index
    %11 = vector.load %arg4[%c0_8, %c0_9] : memref<1x128xf32, #tpu.memory_space<vmem>>, vector<1x128xf32>
    %12 = vector.shape_cast %11 : vector<1x128xf32> to vector<1x1x128xf32>
    %13 = vector.shape_cast %12 : vector<1x1x128xf32> to vector<1x1x128xf32>
    %14 = vector.broadcast %13 : vector<1x1x128xf32> to vector<2x1x128xf32>
    %15 = arith.truncf %14 : vector<2x1x128xf32> to vector<2x1x128xbf16>
    %c0_10 = arith.constant 0 : index
    %c0_11 = arith.constant 0 : index
    %c0_12 = arith.constant 0 : index
    %16 = vector.load %arg5[%c0_10, %c0_11, %c0_12] : memref<2x17x128xbf16, #tpu.memory_space<vmem>>, vector<2x1x128xbf16>
    tpu.vector_store %arg5[%c0_10, %c0_11, %c0_12], %15 {strides = array<i32>} : memref<2x17x128xbf16, #tpu.memory_space<vmem>>, vector<2x1x128xbf16>,
    return
  }
  func.func @transform_0(%arg0: i32) -> (i32, i32, i32) {
    %c0_i32 = arith.constant 0 : i32
    %c0_i32_0 = arith.constant 0 : i32
    %c0_i32_1 = arith.constant 0 : i32
    return %arg0, %c0_i32, %c0_i32_0 : i32, i32, i32
  }
  func.func @transform_1(%arg0: i32) -> (i32, i32) {
    %c0_i32 = arith.constant 0 : i32
    %c0_i32_0 = arith.constant 0 : i32
    %c0_i32_1 = arith.constant 0 : i32
    return %c0_i32, %c0_i32_0 : i32, i32
  }
  func.func @transform_2(%arg0: i32) -> (i32, i32) {
    %c0_i32 = arith.constant 0 : i32
    %c0_i32_0 = arith.constant 0 : i32
    %c0_i32_1 = arith.constant 0 : i32
    return %c0_i32, %c0_i32_0 : i32, i32
  }
  func.func @transform_3(%arg0: i32) -> (i32, i32) {
    %c0_i32 = arith.constant 0 : i32
    %c0_i32_0 = arith.constant 0 : i32
    %c0_i32_1 = arith.constant 0 : i32
    return %c0_i32, %c0_i32_0 : i32, i32
  }
  func.func @transform_4(%arg0: i32) -> (i32, i32, i32) {
    %c0_i32 = arith.constant 0 : i32
    %c0_i32_0 = arith.constant 0 : i32
    %c0_i32_1 = arith.constant 0 : i32
    return %arg0, %c0_i32, %c0_i32_0 : i32, i32, i32
  }
}

</mosaic_0001>

<bundles_post_ra>
// kernel: embedding_layer.2
= control target key start
LH: loop header
LB: loop body
LE: loop exit
PB: predicated region body
PF: predicated region fallthrough
CT: control target
= control target key end

     0   :  { %s538_s0 = inlined_call_operand.vmem [shape: bf16[128,128], index: 0, kind: input, shape index: {}]   ;;  %s539_s1 = inlined_call_operand.vmem [shape: f32[16,128], index: 1, kind: input, shape index: {}]   ;;  %s540_s2 = inlined_call_operand.vmem [shape: f32[1,128], index: 2, kind: input, shape index: {}]   ;;  %s541_s3 = inlined_call_operand.vmem [shape: bf16[2,16,64], index: 3, kind: input, shape index: {}]   ;;  %s542_s4 = inlined_call_operand.<no memory space> [shape: bf16[], index: 4, kind: input, shape index: {}]   ;;  %s543_s5 = inlined_call_operand.vmem [shape: bf16[2,17,128], index: 5, kind: output, shape index: {}]  }
   0x1   :  { %v10_v0 = vstv %s542_s4 }
   0x2   :  { %v11_v1 = vunpack.i.l.bf16 %v10_v0 }
   0x3   :  { %v383_v2 = vld [vmem:[%s538_s0] sm:$0xff]   ;;  %v35_v3 = vlaneseq  ;;  %v384_v4 = vld [vmem:[%s538_s0 + $0x8] sm:$0xff]   ;;  %v385_v5 = vld [vmem:[%s538_s0 + $0x10] sm:$0xff]   ;;  %v393_v19 = vmov 0.0   ;;  %vm300_vm1 = vcmask 1043456   ;;  %vm307_vm5 = vcmask 1040384  }
   0x4   :  { %362 = vmatprep.subr.bf16.mxu0 %v383_v2  ;;  %v386_v7 = vld [vmem:[%s538_s0 + $0x18] sm:$0xff]   ;;  %v32_v8 = vld [vmem:[%s541_s3] sm:$0xff]   ;;  %v332_v9 = vld [vmem:[%s541_s3 + $0x8] sm:$0xff]   ;;  %vm301_vm2 = vsmask.f32 7938 }
   0x5   :  { %363 = vmatpush3.bf16.msra.mxu0 %v383_v2  ;;  %v36_v6 = vand.u32 127, %v35_v3  ;;  %v33_v10 = vunpack.c.l.bf16 %v32_v8  ;;  %v54_v11 = vunpack.c.h.bf16 %v32_v8  ;;  %v76_v12 = vunpack.c.l.bf16 %v332_v9  ;;  %v387_v18 = vld [vmem:[%s538_s0 + $0x20] sm:$0xff]   ;;  %v388_v24 = vld [vmem:[%s538_s0 + $0x28] sm:$0xff]   ;;  %v389_v25 = vld [vmem:[%s538_s0 + $0x30] sm:$0xff]  }
   0x6   :  { %364 = vmatprep.subr.bf16.mxu0 %v384_v4  ;;  %v98_v13 = vunpack.c.h.bf16 %v332_v9  ;;  %v390_v27 = vld [vmem:[%s538_s0 + $0x38] sm:$0xff]   ;;  %v239_v29 = vld [vmem:[%s539_s1] sm:$0xff]  ;;  %v240_v31 = vld [vmem:[%s539_s1 + $0x8] sm:$0xff]  ;;  %vm257_vm3 = vsmask.f32 256 }
   0x7   :  { %vm38_vm0 = vcmp.lt.s32.totalorder %v36_v6, 64  ;;  %vm258_vm4 = vsmask.f32 4368  ;;  %vm463_vm6 = vmand %vm300_vm1, %vm301_vm2  ;;  %v312_v49 = vld [vmem:[%s543_s5 + $0xc] sm:$0xf] }
   0x8   :  { %v39_v14 = vsel %vm38_vm0, %v33_v10, %v11_v1  ;;  %v60_v15 = vsel %vm38_vm0, %v54_v11, %v11_v1  ;;  %v82_v16 = vsel %vm38_vm0, %v76_v12, %v11_v1  ;;  %v104_v17 = vsel %vm38_vm0, %v98_v13, %v11_v1  ;;  %v303_v54 = vld [vmem:[%s543_s5] sm:$0xf]  ;;  %vm474_vm7 = vmor %vm257_vm3, %vm258_vm4  ;;  %v316_v60 = vld [vmem:[%s543_s5 + $0x14] sm:$0x1] }
   0x9   :  { %365 = vmatpush3.bf16.msra.mxu0 %v384_v4  ;;  %v40_v20 = vpack.c.bf16 %v393_v19, %v39_v14  ;;  %v62_v21 = vpack.c.bf16 %v393_v19, %v60_v15  ;;  %v84_v22 = vpack.c.bf16 %v393_v19, %v82_v16  ;;  %v106_v23 = vpack.c.bf16 %v393_v19, %v104_v17  ;;  %vm479_vm8 = vmand %vm307_vm5, %vm257_vm3  ;;  %v309_v3 = vld [vmem:[%s543_s5 + $0x8] sm:$0x1]  ;;  %v319_v10 = vld [vmem:[%s540_s2] sm:$0x1] }
   0xa   :  { %366 = vmatprep.subr.bf16.mxu0 %v385_v5  ;;  %v320_v13 = vpack.c.bf16 %v319_v10, %v319_v10 }
   0xb   :  { %42 = vst [vmem:[#allocation7] sm:$0xf] %v40_v20  ;;  %64 = vst [vmem:[#allocation7 + $0x4] sm:$0xf] %v62_v21 }
   0xc   :  { %86 = vst [vmem:[#allocation7 + $0x8] sm:$0xf] %v84_v22  ;;  %108 = vst [vmem:[#allocation7 + $0xc] sm:$0xf] %v106_v23 }
   0xd   :  { %367 = vmatpush3.bf16.msra.mxu0 %v385_v5 }
   0xe   :  { %368 = vmatprep.subr.bf16.mxu0 %v386_v7 }
  0x11   :  { %369 = vmatpush3.bf16.msra.mxu0 %v386_v7 }
  0x12   :  { %370 = vmatprep.subr.bf16.mxu0 %v387_v18  ;;  %v391_v26 = vld [vmem:[#allocation7] sm:$0xff]  }
  0x13   :  { %378 = vmatprep.mubr.bf16.mxu0 %v391_v26  ;;  %v392_v28 = vld [vmem:[#allocation7 + $0x8] sm:$0xff]  }
  0x15   :  { %371 = vmatpush3.bf16.msra.mxu0 %v387_v18 }
  0x16   :  { %372 = vmatprep.subr.bf16.mxu0 %v388_v24 }
  0x19   :  { %373 = vmatpush3.bf16.msra.mxu0 %v388_v24 }
  0x1a   :  { %374 = vmatprep.subr.bf16.mxu0 %v389_v25 }
  0x1d   :  { %375 = vmatpush3.bf16.msra.mxu0 %v389_v25 }
  0x1e   :  { %376 = vmatprep.subr.bf16.mxu0 %v390_v27 }
  0x21   :  { %377 = vmatpush3.bf16.msra.mxu0 %v390_v27 }
  0x24   :  { %379 = vmatmul.mubr.bf16.vlgmr.msra.gmra.mrb[0].mxu0 %v392_v28 }
  0xf7   :  { %v380_v30 = vpop.f32.mrb[0].mxu0 }
  0xf8   :  { %v243_v32 = vadd.f32 %v380_v30, %v239_v29  ;;  %v224_v33 = vpop.f32.mrb[1].mxu0 }
  0xf9   :  { %v241_v34 = vadd.f32 %v239_v29, %v224_v33  ;;  %v381_v35 = vpop.f32.mrb[2].mxu0 }
  0xfa   :  { %v350_v36 = vpack.c.bf16 %v243_v32, %v243_v32  ;;  %v244_v37 = vadd.f32 %v381_v35, %v240_v31  ;;  %v227_v38 = vpop.f32.mrb[3].mxu0 }
  0xfb   :  { %v348_v39 = vpack.c.bf16 %v241_v34, %v241_v34  ;;  %v242_v40 = vadd.f32 %v240_v31, %v227_v38 }
  0xfc   :  { %v278_v41 = vshrl.u32 %v350_v36, 16  ;;  %v351_v42 = vpack.c.bf16 %v244_v37, %v244_v37  ;;  %v281_v46 = vshll.u32 %v350_v36, 16 }
  0xfd   :  { %v261_v43 = vshrl.u32 %v348_v39, 16  ;;  %v349_v44 = vpack.c.bf16 %v242_v40, %v242_v40  ;;  %v264_v51 = vshll.u32 %v348_v39, 16 }
  0xfe   :  { %v280_v45 = vrot.slane %v278_v41, 7  ;;  %v286_v47 = vshrl.u32 %v351_v42, 16  ;;  %v289_v57 = vshll.u32 %v351_v42, 16 }
  0xff   :  { %v263_v50 = vrot.slane %v261_v43, 7  ;;  %v269_v52 = vshrl.u32 %v349_v44, 16  ;;  %v272_v62 = vshll.u32 %v349_v44, 16 }
 0x100   :  { %v283_v53 = vor.u32 %v281_v46, %v280_v45  ;;  %v288_v56 = vrot.slane %v286_v47, 7  ;;  %v284_v63 = vrot.slane %v280_v45, 4 }
 0x101   :  { %v266_v58 = vor.u32 %v264_v51, %v263_v50  ;;  %v271_v61 = vrot.slane %v269_v52, 7  ;;  %v267_v4 = vrot.slane %v263_v50, 4 }
 0x102   :  { %v313_v0 = vsel %vm463_vm6, %v283_v53, %v312_v49  ;;  %v291_v1 = vor.u32 %v289_v57, %v288_v56  ;;  %v293_v2 = vrot.slane %v288_v56, 4 }
 0x103   :  { %314 = vst [vmem:[%s543_s5 + $0xc] sm:$0xf] %v313_v0  ;;  %v304_v5 = vsel %vm463_vm6, %v266_v58, %v303_v54  ;;  %v274_v6 = vor.u32 %v272_v62, %v271_v61  ;;  %v276_v7 = vrot.slane %v271_v61, 4 }
 0x104   :  { %305 = vst [vmem:[%s543_s5] sm:$0xf] %v304_v5  ;;  %v292_v8 = vsel %vm474_vm7, %v284_v63, %v291_v1  ;;  %v317_v9 = vsel %vm479_vm8, %v293_v2, %v316_v60 }
 0x105   :  { %315 = vst [vmem:[%s543_s5 + $0x10] sm:$0xf] %v292_v8  ;;  %318 = vst [vmem:[%s543_s5 + $0x14] sm:$0x1] %v317_v9  ;;  %v275_v11 = vsel %vm474_vm7, %v267_v4, %v274_v6  ;;  %v310_v12 = vsel %vm479_vm8, %v276_v7, %v309_v3 }
 0x106   :  { %306 = vst [vmem:[%s543_s5 + $0x4] sm:$0xf] %v275_v11  ;;  %311 = vst [vmem:[%s543_s5 + $0x8] sm:$0x1] %v310_v12 }
 0x10a   :  { %v324_v14 = vld [vmem:[%s543_s5 + $0xc] sm:$0x1] }
 0x10b   :  { %v321_v15 = vld [vmem:[%s543_s5] sm:$0x1]  ;;  %v325_v16 = vsel %vm479_vm8, %v320_v13, %v324_v14 }
 0x10c   :  { %v322_v17 = vsel %vm479_vm8, %v320_v13, %v321_v15  ;;  %326 = vst [vmem:[%s543_s5 + $0xc] sm:$0x1] %v325_v16 }
 0x10d   :  { %323 = vst [vmem:[%s543_s5] sm:$0x1] %v322_v17 }

// kernel: embedding_layer.2
= control target key start
LH: loop header
LB: loop body
LE: loop exit
PB: predicated region body
PF: predicated region fallthrough
CT: control target
= control target key end

     0   :  { %s538_s0 = inlined_call_operand.vmem [shape: bf16[128,128], index: 0, kind: input, shape index: {}]   ;;  %s539_s1 = inlined_call_operand.vmem [shape: f32[16,128], index: 1, kind: input, shape index: {}]   ;;  %s540_s2 = inlined_call_operand.vmem [shape: f32[1,128], index: 2, kind: input, shape index: {}]   ;;  %s541_s3 = inlined_call_operand.vmem [shape: bf16[2,16,64], index: 3, kind: input, shape index: {}]   ;;  %s542_s4 = inlined_call_operand.<no memory space> [shape: bf16[], index: 4, kind: input, shape index: {}]   ;;  %s543_s5 = inlined_call_operand.vmem [shape: bf16[2,17,128], index: 5, kind: output, shape index: {}]  }
   0x1   :  { %v10_v0 = vstv %s542_s4 }
   0x2   :  { %v11_v1 = vunpack.i.l.bf16 %v10_v0 }
   0x3   :  { %v383_v2 = vld [vmem:[%s538_s0] sm:$0xff]   ;;  %v35_v3 = vlaneseq  ;;  %v384_v4 = vld [vmem:[%s538_s0 + $0x8] sm:$0xff]   ;;  %v385_v5 = vld [vmem:[%s538_s0 + $0x10] sm:$0xff]   ;;  %v393_v19 = vmov 0.0   ;;  %vm300_vm1 = vcmask 1043456   ;;  %vm307_vm5 = vcmask 1040384  }
   0x4   :  { %362 = vmatprep.subr.bf16.mxu0 %v383_v2  ;;  %v386_v7 = vld [vmem:[%s538_s0 + $0x18] sm:$0xff]   ;;  %v32_v8 = vld [vmem:[%s541_s3] sm:$0xff]   ;;  %v332_v9 = vld [vmem:[%s541_s3 + $0x8] sm:$0xff]   ;;  %vm301_vm2 = vsmask.f32 7938 }
   0x5   :  { %363 = vmatpush3.bf16.msra.mxu0 %v383_v2  ;;  %v36_v6 = vand.u32 127, %v35_v3  ;;  %v33_v10 = vunpack.c.l.bf16 %v32_v8  ;;  %v54_v11 = vunpack.c.h.bf16 %v32_v8  ;;  %v76_v12 = vunpack.c.l.bf16 %v332_v9  ;;  %v387_v18 = vld [vmem:[%s538_s0 + $0x20] sm:$0xff]   ;;  %v388_v24 = vld [vmem:[%s538_s0 + $0x28] sm:$0xff]   ;;  %v389_v25 = vld [vmem:[%s538_s0 + $0x30] sm:$0xff]  }
   0x6   :  { %364 = vmatprep.subr.bf16.mxu0 %v384_v4  ;;  %v98_v13 = vunpack.c.h.bf16 %v332_v9  ;;  %v390_v27 = vld [vmem:[%s538_s0 + $0x38] sm:$0xff]   ;;  %v239_v29 = vld [vmem:[%s539_s1] sm:$0xff]  ;;  %v240_v31 = vld [vmem:[%s539_s1 + $0x8] sm:$0xff]  ;;  %vm257_vm3 = vsmask.f32 256 }
   0x7   :  { %vm38_vm0 = vcmp.lt.s32.totalorder %v36_v6, 64  ;;  %vm258_vm4 = vsmask.f32 4368  ;;  %vm463_vm6 = vmand %vm300_vm1, %vm301_vm2  ;;  %v312_v49 = vld [vmem:[%s543_s5 + $0xc] sm:$0xf] }
   0x8   :  { %v39_v14 = vsel %vm38_vm0, %v33_v10, %v11_v1  ;;  %v60_v15 = vsel %vm38_vm0, %v54_v11, %v11_v1  ;;  %v82_v16 = vsel %vm38_vm0, %v76_v12, %v11_v1  ;;  %v104_v17 = vsel %vm38_vm0, %v98_v13, %v11_v1  ;;  %v303_v54 = vld [vmem:[%s543_s5] sm:$0xf]  ;;  %vm474_vm7 = vmor %vm257_vm3, %vm258_vm4  ;;  %v316_v60 = vld [vmem:[%s543_s5 + $0x14] sm:$0x1] }
   0x9   :  { %365 = vmatpush3.bf16.msra.mxu0 %v384_v4  ;;  %v40_v20 = vpack.c.bf16 %v393_v19, %v39_v14  ;;  %v62_v21 = vpack.c.bf16 %v393_v19, %v60_v15  ;;  %v84_v22 = vpack.c.bf16 %v393_v19, %v82_v16  ;;  %v106_v23 = vpack.c.bf16 %v393_v19, %v104_v17  ;;  %vm479_vm8 = vmand %vm307_vm5, %vm257_vm3  ;;  %v309_v3 = vld [vmem:[%s543_s5 + $0x8] sm:$0x1]  ;;  %v319_v10 = vld [vmem:[%s540_s2] sm:$0x1] }
   0xa   :  { %366 = vmatprep.subr.bf16.mxu0 %v385_v5  ;;  %v320_v13 = vpack.c.bf16 %v319_v10, %v319_v10 }
   0xb   :  { %42 = vst [vmem:[#allocation7] sm:$0xf] %v40_v20  ;;  %64 = vst [vmem:[#allocation7 + $0x4] sm:$0xf] %v62_v21 }
   0xc   :  { %86 = vst [vmem:[#allocation7 + $0x8] sm:$0xf] %v84_v22  ;;  %108 = vst [vmem:[#allocation7 + $0xc] sm:$0xf] %v106_v23 }
   0xd   :  { %367 = vmatpush3.bf16.msra.mxu0 %v385_v5 }
   0xe   :  { %368 = vmatprep.subr.bf16.mxu0 %v386_v7 }
  0x11   :  { %369 = vmatpush3.bf16.msra.mxu0 %v386_v7 }
  0x12   :  { %370 = vmatprep.subr.bf16.mxu0 %v387_v18  ;;  %v391_v26 = vld [vmem:[#allocation7] sm:$0xff]  }
  0x13   :  { %378 = vmatprep.mubr.bf16.mxu0 %v391_v26  ;;  %v392_v28 = vld [vmem:[#allocation7 + $0x8] sm:$0xff]  }
  0x15   :  { %371 = vmatpush3.bf16.msra.mxu0 %v387_v18 }
  0x16   :  { %372 = vmatprep.subr.bf16.mxu0 %v388_v24 }
  0x19   :  { %373 = vmatpush3.bf16.msra.mxu0 %v388_v24 }
  0x1a   :  { %374 = vmatprep.subr.bf16.mxu0 %v389_v25 }
  0x1d   :  { %375 = vmatpush3.bf16.msra.mxu0 %v389_v25 }
  0x1e   :  { %376 = vmatprep.subr.bf16.mxu0 %v390_v27 }
  0x21   :  { %377 = vmatpush3.bf16.msra.mxu0 %v390_v27 }
  0x24   :  { %379 = vmatmul.mubr.bf16.vlgmr.msra.gmra.mrb[0].mxu0 %v392_v28 }
  0xf7   :  { %v380_v30 = vpop.f32.mrb[0].mxu0 }
  0xf8   :  { %v243_v32 = vadd.f32 %v380_v30, %v239_v29  ;;  %v224_v33 = vpop.f32.mrb[1].mxu0 }
  0xf9   :  { %v241_v34 = vadd.f32 %v239_v29, %v224_v33  ;;  %v381_v35 = vpop.f32.mrb[2].mxu0 }
  0xfa   :  { %v350_v36 = vpack.c.bf16 %v243_v32, %v243_v32  ;;  %v244_v37 = vadd.f32 %v381_v35, %v240_v31  ;;  %v227_v38 = vpop.f32.mrb[3].mxu0 }
  0xfb   :  { %v348_v39 = vpack.c.bf16 %v241_v34, %v241_v34  ;;  %v242_v40 = vadd.f32 %v240_v31, %v227_v38 }
  0xfc   :  { %v278_v41 = vshrl.u32 %v350_v36, 16  ;;  %v351_v42 = vpack.c.bf16 %v244_v37, %v244_v37  ;;  %v281_v46 = vshll.u32 %v350_v36, 16 }
  0xfd   :  { %v261_v43 = vshrl.u32 %v348_v39, 16  ;;  %v349_v44 = vpack.c.bf16 %v242_v40, %v242_v40  ;;  %v264_v51 = vshll.u32 %v348_v39, 16 }
  0xfe   :  { %v280_v45 = vrot.slane %v278_v41, 7  ;;  %v286_v47 = vshrl.u32 %v351_v42, 16  ;;  %v289_v57 = vshll.u32 %v351_v42, 16 }
  0xff   :  { %v263_v50 = vrot.slane %v261_v43, 7  ;;  %v269_v52 = vshrl.u32 %v349_v44, 16  ;;  %v272_v62 = vshll.u32 %v349_v44, 16 }
 0x100   :  { %v283_v53 = vor.u32 %v281_v46, %v280_v45  ;;  %v288_v56 = vrot.slane %v286_v47, 7  ;;  %v284_v63 = vrot.slane %v280_v45, 4 }
 0x101   :  { %v266_v58 = vor.u32 %v264_v51, %v263_v50  ;;  %v271_v61 = vrot.slane %v269_v52, 7  ;;  %v267_v4 = vrot.slane %v263_v50, 4 }
 0x102   :  { %v313_v0 = vsel %vm463_vm6, %v283_v53, %v312_v49  ;;  %v291_v1 = vor.u32 %v289_v57, %v288_v56  ;;  %v293_v2 = vrot.slane %v288_v56, 4 }
 0x103   :  { %314 = vst [vmem:[%s543_s5 + $0xc] sm:$0xf] %v313_v0  ;;  %v304_v5 = vsel %vm463_vm6, %v266_v58, %v303_v54  ;;  %v274_v6 = vor.u32 %v272_v62, %v271_v61  ;;  %v276_v7 = vrot.slane %v271_v61, 4 }
 0x104   :  { %305 = vst [vmem:[%s543_s5] sm:$0xf] %v304_v5  ;;  %v292_v8 = vsel %vm474_vm7, %v284_v63, %v291_v1  ;;  %v317_v9 = vsel %vm479_vm8, %v293_v2, %v316_v60 }
 0x105   :  { %315 = vst [vmem:[%s543_s5 + $0x10] sm:$0xf] %v292_v8  ;;  %318 = vst [vmem:[%s543_s5 + $0x14] sm:$0x1] %v317_v9  ;;  %v275_v11 = vsel %vm474_vm7, %v267_v4, %v274_v6  ;;  %v310_v12 = vsel %vm479_vm8, %v276_v7, %v309_v3 }
 0x106   :  { %306 = vst [vmem:[%s543_s5 + $0x4] sm:$0xf] %v275_v11  ;;  %311 = vst [vmem:[%s543_s5 + $0x8] sm:$0x1] %v310_v12 }
 0x10a   :  { %v324_v14 = vld [vmem:[%s543_s5 + $0xc] sm:$0x1] }
 0x10b   :  { %v321_v15 = vld [vmem:[%s543_s5] sm:$0x1]  ;;  %v325_v16 = vsel %vm479_vm8, %v320_v13, %v324_v14 }
 0x10c   :  { %v322_v17 = vsel %vm479_vm8, %v320_v13, %v321_v15  ;;  %326 = vst [vmem:[%s543_s5 + $0xc] sm:$0x1] %v325_v16 }
 0x10d   :  { %323 = vst [vmem:[%s543_s5] sm:$0x1] %v322_v17 }

</bundles_post_ra>
